<compile_context>
chip_gen: v7x
topology: tpu7x:2x2x1
jax: 0.10.0
libtpu: 0.0.40
codegen_flags: <defaults>
</compile_context>

<pallas_src>
import functools

import jax
import jax.numpy as jnp
from jax.experimental import pallas as pl
from jax.experimental.pallas import tpu as pltpu


# ----------------------------- Pallas kernel --------------------------------
def _patch_embed_matmul_kernel(xp_ref, w_ref, b_ref, o_ref, acc_ref):
    # xp_ref : (tm, tk)  bf16 activation patches
    # w_ref  : (tk, tn)  bf16 flattened conv weight
    # b_ref  : (1,  tn)  f32 bias row
    # o_ref  : (tm, tn)  f32 output tile
    # acc_ref: (tm, tn)  f32 accumulator scratch (resident across k steps)
    k = pl.program_id(2)

    @pl.when(k == 0)
    def _init():
        acc_ref[...] = jnp.zeros_like(acc_ref)

    acc_ref[...] += jnp.dot(xp_ref[...], w_ref[...],
                            preferred_element_type=jnp.float32)

    @pl.when(k == pl.num_programs(2) - 1)
    def _finalize():
        # bias add + cast + store only once per output tile (last k step).
        o_ref[...] = (acc_ref[...] + b_ref[...]).astype(o_ref.dtype)


def _round_up(v, m):
    return ((v + m - 1) // m) * m


# ------------------------------- wrapper -------------------------------------
@functools.partial(jax.jit, static_argnames=("patch_size", "patch_stride",
                                             "tm", "tn", "tk"))
def patch_embedding_pallas(x, weight, bias, patch_size, patch_stride,
                           *, tm=256, tn=512, tk=512):
    """
    x:      (B, T, C_in)   float32
    weight: (d_model, C_in, patch_size)   (torch Conv1d.weight layout)
    bias:   (d_model,)
    returns (B, L, d_model),  L = (T - patch_size)//patch_stride + 1
    """
    patch_stride = patch_stride if patch_stride > 0 else patch_size
    B, T, C = x.shape
    d_model = weight.shape[0]
    P = patch_size
    L = (T - P) // patch_stride + 1

    # ---- glue: patch extraction, (B, L, P, C), flattened in (P, C) order ----
    if patch_stride == P:
        # Non-overlapping patches: pure reshape, no gather / no activation copy.
        patches = x[:, :L * P, :].reshape(B, L, P, C)
    else:
        # Overlapping patches: fall back to a gather.
        # TODO(synk): fold overlapping patch extraction into the kernel via a
        # BlockSpec over L (pl.Element offset = l*stride) to avoid HBM duplication.
        idx = jnp.arange(L)[:, None] * patch_stride + jnp.arange(P)[None, :]
        patches = x[:, idx, :]                           # (B, L, P, C)

    xp = patches.reshape(B * L, P * C)                   # (M, K), K in (P,C) order

    # Weight transposed instead of activations: (d_model, C, P) -> (P, C, d_model)
    w_mat = jnp.transpose(weight, (2, 1, 0)).reshape(P * C, d_model)   # (K, N)
    b_row = bias.astype(jnp.float32).reshape(1, d_model)               # (1, N)

    M, K = xp.shape
    N = d_model

    # bf16 MXU inputs, f32 accumulation.
    xp = xp.astype(jnp.bfloat16)
    w_mat = w_mat.astype(jnp.bfloat16)

    # ---- tile sizing + alignment padding (lane-dense N/K, 16-aligned M) ----
    tm_eff = min(tm, _round_up(M, 16))
    tn_eff = min(tn, _round_up(N, 128))
    tk_eff = min(tk, _round_up(K, 128))

    Mp = _round_up(M, tm_eff)
    Np = _round_up(N, tn_eff)
    Kp = _round_up(K, tk_eff)

    if (Mp, Kp) != (M, K):
        xp = jnp.pad(xp, ((0, Mp - M), (0, Kp - K)))
    if (Kp, Np) != (K, N):
        w_mat = jnp.pad(w_mat, ((0, Kp - K), (0, Np - N)))
    if Np != N:
        b_row = jnp.pad(b_row, ((0, 0), (0, Np - N)))

    grid = (Mp // tm_eff, Np // tn_eff, Kp // tk_eff)

    # VMEM budget: double-buffered bf16 input tiles + f32 output tiles + f32 acc.
    tile_bytes = (2 * (tm_eff * tk_eff + tk_eff * tn_eff) * 2
                  + 2 * tn_eff * 4
                  + 2 * tm_eff * tn_eff * 4
                  + tm_eff * tn_eff * 4)
    vmem_limit = int(min(max(2 * tile_bytes, 16 << 20), 48 << 20))

    out = pl.pallas_call(
        _patch_embed_matmul_kernel,
        out_shape=jax.ShapeDtypeStruct((Mp, Np), jnp.float32),
        grid_spec=pltpu.PrefetchScalarGridSpec(
            num_scalar_prefetch=0,
            grid=grid,
            in_specs=[
                pl.BlockSpec((tm_eff, tk_eff), lambda i, j, k: (i, k)),
                pl.BlockSpec((tk_eff, tn_eff), lambda i, j, k: (k, j)),
                pl.BlockSpec((1, tn_eff), lambda i, j, k: (0, j)),
            ],
            out_specs=pl.BlockSpec((tm_eff, tn_eff), lambda i, j, k: (i, j)),
            scratch_shapes=[pltpu.VMEM((tm_eff, tn_eff), jnp.float32)],
        ),
        compiler_params=pltpu.CompilerParams(
            dimension_semantics=("parallel", "parallel", "arbitrary"),
            vmem_limit_bytes=vmem_limit,
        ),
    )(xp, w_mat, b_row)

    return out[:M, :N].reshape(B, L, d_model)


# ----------------------------- references (check) ----------------------------
def _reference_f32(x, weight, bias, patch_size, patch_stride):
    # Exact torch Conv1d semantics in f32 (NCL layout).
    x_ncl = jnp.transpose(x, (0, 2, 1))                  # (B, C, T)
    y = jax.lax.conv_general_dilated(
        x_ncl, weight,
        window_strides=(patch_stride,),
        padding="VALID",
        dimension_numbers=("NCH", "OIH", "NCH"),
    )
    y = y + bias[None, :, None]
    return jnp.transpose(y, (0, 2, 1))                   # (B, L, d_model)


def _reference_bf16_inputs(x, weight, bias, patch_size, patch_stride):
    # Same math but with bf16-rounded matmul inputs (matches kernel precision).
    xb = x.astype(jnp.bfloat16).astype(jnp.float32)
    wb = weight.astype(jnp.bfloat16).astype(jnp.float32)
    return _reference_f32(xb, wb, bias, patch_size, patch_stride)


# ----------------------------------- main -------------------------------------
if __name__ == "__main__":
    # small deterministic config
    B, T, C_in = 2, 16, 4
    d_model = 32
    patch_size = 4
    patch_stride = 4   # -> L = 4

    key = jax.random.PRNGKey(0)
    kx, kw, kb = jax.random.split(key, 3)

    x = jax.random.normal(kx, (B, T, C_in), dtype=jnp.float32)
    fan_in = C_in * patch_size
    bound = 1.0 / (fan_in ** 0.5)
    weight = jax.random.uniform(kw, (d_model, C_in, patch_size),
                                minval=-bound, maxval=bound, dtype=jnp.float32)
    bias = jax.random.uniform(kb, (d_model,),
                              minval=-bound, maxval=bound, dtype=jnp.float32)

    out = patch_embedding_pallas(x, weight, bias, patch_size, patch_stride)
    out = jax.block_until_ready(out)

    L = (T - patch_size) // patch_stride + 1
    assert out.shape == (B, L, d_model)

    # Tight check vs. a reference that uses the same bf16-rounded matmul inputs.
    ref_bf16 = _reference_bf16_inputs(x, weight, bias, patch_size, patch_stride)
    assert jnp.allclose(out, ref_bf16, atol=1e-4, rtol=1e-4)

    # Loose check vs. the exact f32 module (bf16 MXU inputs, f32 accumulation).
    ref_f32 = _reference_f32(x, weight, bias, patch_size, patch_stride)
    assert jnp.allclose(out, ref_f32, atol=2e-2, rtol=2e-2)

    print("KERNEL_OK")
</pallas_src>

<mosaic_0001>
module attributes {stable_mosaic.version = 11 : i64} {
  func.func @_patch_embed_matmul_kernel(%arg0: i32, %arg1: i32, %arg2: i32, %arg3: memref<16x128xbf16, #tpu.memory_space<vmem>>, %arg4: memref<128x128xbf16, #tpu.memory_space<vmem>>, %arg5: memref<1x128xf32, #tpu.memory_space<vmem>>, %arg6: memref<16x128xf32, #tpu.memory_space<vmem>>, %arg7: memref<16x128xf32, #tpu.memory_space<vmem>>) attributes {dimension_semantics = [#tpu.dimension_semantics<parallel>, #tpu.dimension_semantics<parallel>, #tpu.dimension_semantics<arbitrary>], iteration_bounds = array<i64: 1, 1, 1>, scalar_prefetch = 0 : i64, scratch_operands = 1 : i64, tpu.core_type = #tpu.core_type<tc>, window_params = [{transform_indices = @transform_0, window_bounds = array<i64: 16, 128>}, {transform_indices = @transform_1, window_bounds = array<i64: 128, 128>}, {transform_indices = @transform_2, window_bounds = array<i64: 1, 128>}, {transform_indices = @transform_3, window_bounds = array<i64: 16, 128>}]} {
    %c0_i32 = arith.constant 0 : i32
    %0 = arith.cmpi eq, %arg2, %c0_i32 : i32
    %1 = arith.extui %0 : i1 to i32
    %c0_i32_0 = arith.constant 0 : i32
    %2 = arith.cmpi ne, %1, %c0_i32_0 : i32
    scf.if %2 {
      %cst_10 = arith.constant 0.000000e+00 : f32
      %12 = vector.broadcast %cst_10 : f32 to vector<16x128xf32>
      %c0_11 = arith.constant 0 : index
      %c0_12 = arith.constant 0 : index
      %13 = vector.load %arg7[%c0_11, %c0_12] : memref<16x128xf32, #tpu.memory_space<vmem>>, vector<16x128xf32>
      tpu.vector_store %arg7[%c0_11, %c0_12], %12 {strides = array<i32>} : memref<16x128xf32, #tpu.memory_space<vmem>>, vector<16x128xf32>,
    } else {
    }
    %c0 = arith.constant 0 : index
    %c0_1 = arith.constant 0 : index
    %3 = vector.load %arg7[%c0, %c0_1] : memref<16x128xf32, #tpu.memory_space<vmem>>, vector<16x128xf32>
    %c0_2 = arith.constant 0 : index
    %c0_3 = arith.constant 0 : index
    %4 = vector.load %arg3[%c0_2, %c0_3] : memref<16x128xbf16, #tpu.memory_space<vmem>>, vector<16x128xbf16>
    %c0_4 = arith.constant 0 : index
    %c0_5 = arith.constant 0 : index
    %5 = vector.load %arg4[%c0_4, %c0_5] : memref<128x128xbf16, #tpu.memory_space<vmem>>, vector<128x128xbf16>
    %cst = arith.constant dense<0.000000e+00> : vector<16x128xf32>
    %6 = tpu.matmul %4, %5, %cst {dimension_numbers = #tpu.dot_dimension_numbers<[1], [0], [0], [1], [0, 0, 1, 1], [], []>} : vector<16x128xbf16>, vector<128x128xbf16>, vector<16x128xf32> -> vector<16x128xf32>
    %7 = arith.addf %3, %6 : vector<16x128xf32>
    %c0_6 = arith.constant 0 : index
    %c0_7 = arith.constant 0 : index
    %8 = vector.load %arg7[%c0_6, %c0_7] : memref<16x128xf32, #tpu.memory_space<vmem>>, vector<16x128xf32>
    tpu.vector_store %arg7[%c0_6, %c0_7], %7 {strides = array<i32>} : memref<16x128xf32, #tpu.memory_space<vmem>>, vector<16x128xf32>,
    %c0_i32_8 = arith.constant 0 : i32
    %9 = arith.cmpi eq, %arg2, %c0_i32_8 : i32
    %10 = arith.extui %9 : i1 to i32
    %c0_i32_9 = arith.constant 0 : i32
    %11 = arith.cmpi ne, %10, %c0_i32_9 : i32
    scf.if %11 {
      %c0_10 = arith.constant 0 : index
      %c0_11 = arith.constant 0 : index
      %12 = vector.load %arg7[%c0_10, %c0_11] : memref<16x128xf32, #tpu.memory_space<vmem>>, vector<16x128xf32>
      %c0_12 = arith.constant 0 : index
      %c0_13 = arith.constant 0 : index
      %13 = vector.load %arg5[%c0_12, %c0_13] : memref<1x128xf32, #tpu.memory_space<vmem>>, vector<1x128xf32>
      %14 = vector.broadcast %13 : vector<1x128xf32> to vector<16x128xf32>
      %15 = arith.addf %12, %14 : vector<16x128xf32>
      %c0_14 = arith.constant 0 : index
      %c0_15 = arith.constant 0 : index
      %16 = vector.load %arg6[%c0_14, %c0_15] : memref<16x128xf32, #tpu.memory_space<vmem>>, vector<16x128xf32>
      tpu.vector_store %arg6[%c0_14, %c0_15], %15 {strides = array<i32>} : memref<16x128xf32, #tpu.memory_space<vmem>>, vector<16x128xf32>,
    } else {
    }
    return
  }
  func.func @transform_0(%arg0: i32, %arg1: i32, %arg2: i32) -> (i32, i32) {
    %c0_i32 = arith.constant 0 : i32
    return %arg0, %arg2 : i32, i32
  }
  func.func @transform_1(%arg0: i32, %arg1: i32, %arg2: i32) -> (i32, i32) {
    %c0_i32 = arith.constant 0 : i32
    return %arg2, %arg1 : i32, i32
  }
  func.func @transform_2(%arg0: i32, %arg1: i32, %arg2: i32) -> (i32, i32) {
    %c0_i32 = arith.constant 0 : i32
    %c0_i32_0 = arith.constant 0 : i32
    return %c0_i32, %arg1 : i32, i32
  }
  func.func @transform_3(%arg0: i32, %arg1: i32, %arg2: i32) -> (i32, i32) {
    %c0_i32 = arith.constant 0 : i32
    return %arg0, %arg1 : i32, i32
  }
}

</mosaic_0001>

<bundles_post_ra>
// kernel: patch_embedding_pallas.1
= control target key start
LH: loop header
LB: loop body
LE: loop exit
PB: predicated region body
PF: predicated region fallthrough
CT: control target
= control target key end

     0   :  { %v210_v0 = vmov 0.0   ;;  %vm211_vm0 = vmmov 0   ;;  %s268_s1 = inlined_call_operand.vmem [shape: bf16[128,128], index: 1, kind: input, shape index: {}]   ;;  %s269_s0 = inlined_call_operand.vmem [shape: bf16[16,128], index: 0, kind: input, shape index: {}]   ;;  %s270_s2 = inlined_call_operand.vmem [shape: f32[1,128], index: 2, kind: input, shape index: {}]   ;;  %s271_s3 = inlined_call_operand.vmem [shape: f32[16,128], index: 3, kind: output, shape index: {}]  }
   0x1   :  { %179 = vmatprep.subr.bf16.mxu0 %v210_v0  ;;  %v201_v1 = vld [vmem:[%s268_s1] sm:$0xff]   ;;  %195 = vmatprep.mubr.msk.bf16.mxu0 %vm211_vm0, %v210_v0  ;;  %v202_v2 = vld [vmem:[%s268_s1 + $0x8] sm:$0xff]   ;;  %v203_v3 = vld [vmem:[%s268_s1 + $0x10] sm:$0xff]  }
   0x2   :  { %180 = vmatpush3.bf16.msra.mxu0 %v201_v1  ;;  %v204_v4 = vld [vmem:[%s268_s1 + $0x18] sm:$0xff]   ;;  %v205_v5 = vld [vmem:[%s268_s1 + $0x20] sm:$0xff]   ;;  %v206_v6 = vld [vmem:[%s268_s1 + $0x28] sm:$0xff]  }
   0x3   :  { %181 = vmatprep.subr.bf16.mxu0 %v210_v0  ;;  %v207_v7 = vld [vmem:[%s268_s1 + $0x30] sm:$0xff]   ;;  %v208_v8 = vld [vmem:[%s268_s1 + $0x38] sm:$0xff]   ;;  %v209_v9 = vld [vmem:[%s269_s0] sm:$0xff]  }
   0x4   :  { %v169_v10 = vld [vmem:[%s270_s2] ss:$0 sm:$0xff] }
   0x6   :  { %182 = vmatpush3.bf16.msra.mxu0 %v202_v2 }
   0x7   :  { %183 = vmatprep.subr.bf16.mxu0 %v210_v0 }
   0xa   :  { %184 = vmatpush3.bf16.msra.mxu0 %v203_v3 }
   0xb   :  { %185 = vmatprep.subr.bf16.mxu0 %v210_v0 }
   0xe   :  { %186 = vmatpush3.bf16.msra.mxu0 %v204_v4 }
   0xf   :  { %187 = vmatprep.subr.bf16.mxu0 %v210_v0 }
  0x12   :  { %188 = vmatpush3.bf16.msra.mxu0 %v205_v5 }
  0x13   :  { %189 = vmatprep.subr.bf16.mxu0 %v210_v0 }
  0x16   :  { %190 = vmatpush3.bf16.msra.mxu0 %v206_v6 }
  0x17   :  { %191 = vmatprep.subr.bf16.mxu0 %v210_v0 }
  0x1a   :  { %192 = vmatpush3.bf16.msra.mxu0 %v207_v7 }
  0x1b   :  { %193 = vmatprep.subr.bf16.mxu0 %v210_v0 }
  0x1e   :  { %194 = vmatpush3.bf16.msra.mxu0 %v208_v8 }
  0x21   :  { %196 = vmatmul.mubr.bf16.vlgmr.msra.gmra.mrb[0].mxu0 %v209_v9 }
  0xf4   :  { %v129_v11 = vpop.f32.mrb[0].mxu0 }
  0xf5   :  { %v152_v12 = vadd.f32 %v169_v10, %v129_v11  ;;  %v197_v13 = vpop.f32.mrb[1].mxu0 }
  0xf6   :  { %v132_v14 = vpop.f32.mrb[2].mxu0 }
  0xf7   :  { %154 = vst [vmem:[%s271_s3] sm:$0xff] %v152_v12  ;;  %v153_v15 = vadd.f32 %v169_v10, %v132_v14  ;;  %v198_v16 = vpop.f32.mrb[3].mxu0 }
  0xf9   :  { %155 = vst [vmem:[%s271_s3 + $0x8] sm:$0xff] %v153_v15 }

</bundles_post_ra>
